<compile_context>
chip_gen: v7x
topology: tpu7x:2x2x1
jax: 0.10.0
libtpu: 0.0.40
codegen_flags: <defaults>
</compile_context>

<pallas_src>
import functools

import jax
import jax.numpy as jnp
from jax import lax
from jax.experimental import pallas as pl
from jax.experimental.pallas import tpu as pltpu


def _round_up(x, m):
    return (x + m - 1) // m * m


def _supcon_kernel(anchor_ref, contrast_ref, rowinfo_ref, col_lab_ref, out_ref, *,
                   inv_temperature, loss_scale, n_a, n_c, tm, use_label_ids):
    # anchor_ref   : [TM, D]    feature tile for this block of anchor rows
    # contrast_ref : [N_c, D]   full contrast slab (resident across the grid)
    # rowinfo_ref  : [TM, 1] i32 row labels (label path)  OR  [TM, N_c] f32 mask rows
    # col_lab_ref  : [1, N_c] i32 column labels (ignored on the explicit-mask path)
    # out_ref      : [TM, 1]    per-anchor-row loss (0 for padded rows)
    a = anchor_ref[...]
    c = contrast_ref[...]

    # logits = (A @ C^T) / temperature — contraction over D, f32 MXU accumulation,
    # no materialized transpose of the contrast slab.
    logits = lax.dot_general(
        a, c, dimension_numbers=(((1,), (1,)), ((), ())),
        preferred_element_type=jnp.float32) * inv_temperature

    # numerical stability: subtract per-row max over ALL contrast columns
    # (including self), exactly as the reference does.
    logits = logits - jnp.max(logits, axis=1, keepdims=True)

    # reconstruct masks in-kernel (no [N_a, N_c] mask HBM traffic on the label path)
    row0 = pl.program_id(0) * tm
    col_idx = lax.broadcasted_iota(jnp.int32, (tm, n_c), 1)
    row_idx = lax.broadcasted_iota(jnp.int32, (tm, n_c), 0) + row0
    not_self = col_idx != row_idx                      # == 1 - eye(N_a, N_c)

    if use_label_ids:
        row_lab = rowinfo_ref[...]                     # [TM, 1] int32
        col_lab = col_lab_ref[...]                     # [1, N_c] int32
        pos_mask = ((row_lab == col_lab) & not_self).astype(jnp.float32)
    else:
        # rare explicit-mask path: mask rows are streamed per tile
        pos_mask = rowinfo_ref[...].astype(jnp.float32) * not_self.astype(jnp.float32)

    # softmax denominator over non-self columns (EUP exp + XLU row reduction)
    exp_logits = jnp.where(not_self, jnp.exp(logits), 0.0)
    log_denom = jnp.log(jnp.sum(exp_logits, axis=1, keepdims=True))

    #   sum_j m_ij * (logit_ij - log_denom_i)
    # = sum_j m_ij * logit_ij  -  cnt_i * log_denom_i
    # -> the full [TM, N_c] log_prob tile is never materialized.
    pos_count = jnp.sum(pos_mask, axis=1, keepdims=True)
    pos_logit_sum = jnp.sum(pos_mask * logits, axis=1, keepdims=True)
    pos_log_prob = pos_logit_sum - pos_count * log_denom

    # padded anchor rows write 0 (and avoid a spurious 0/0 there); real rows keep
    # the reference 0/0 -> NaN behaviour of the PyTorch module.
    row_valid = (lax.broadcasted_iota(jnp.int32, (tm, 1), 0) + row0) < n_a
    safe_count = jnp.where(row_valid, pos_count, 1.0)
    per_row_loss = -loss_scale * pos_log_prob / safe_count
    out_ref[...] = jnp.where(row_valid, per_row_loss, 0.0)


def supcon_loss(features, labels=None, mask=None, *,
                temperature=0.07, contrast_mode="all", base_temperature=0.07):
    """JAX/Pallas equivalent of SupConLoss.forward (returns a scalar loss)."""
    if features.ndim < 3:
        raise ValueError("`features` needs to be [bsz, n_views, ...]")
    if features.ndim > 3:
        features = features.reshape(features.shape[0], features.shape[1], -1)
    bsz, n_views, dim = features.shape

    if labels is not None and mask is not None:
        raise ValueError("Cannot define both `labels` and `mask`")

    contrast_count = n_views
    # torch.cat(torch.unbind(features, dim=1), dim=0): view-major stacking
    contrast_feature = features.transpose(1, 0, 2).reshape(n_views * bsz, dim)

    if contrast_mode == "one":
        anchor_feature = features[:, 0]
        anchor_count = 1
    elif contrast_mode == "all":
        anchor_feature = contrast_feature
        anchor_count = contrast_count
    else:
        raise ValueError(f"Unknown mode: {contrast_mode}")

    n_a = anchor_count * bsz
    n_c = contrast_count * bsz

    use_label_ids = mask is None
    if use_label_ids:
        if labels is None:
            ids = jnp.arange(bsz, dtype=jnp.int32)          # eye(bsz) == SimCLR case
        else:
            labels = jnp.asarray(labels).reshape(-1)
            if labels.shape[0] != bsz:
                raise ValueError("Num of labels does not match num of features")
            ids = labels.astype(jnp.int32)
        row_info = jnp.tile(ids, anchor_count).reshape(n_a, 1)
        col_lab = jnp.tile(ids, contrast_count).reshape(1, n_c)
    else:
        # Explicit user mask: stream the tiled [N_a, N_c] positives mask per row
        # block; the diagonal mask is still generated in-kernel.
        base_mask = jnp.asarray(mask, jnp.float32)
        row_info = jnp.tile(base_mask, (anchor_count, contrast_count))  # [n_a, n_c]
        col_lab = jnp.zeros((1, n_c), jnp.int32)                        # unused

    # Anchor-row tile: take the biggest block (amortizes the ~0.35us per grid
    # step pipeline overhead) such that the [TM, N_c] f32 logits tile plus a
    # handful of same-shaped intermediates stays well inside VMEM (64 MiB on
    # v7x); multiples of 8 for sublane tiling.
    tm = 512
    while tm > 8 and tm * n_c * 4 > (6 << 20):
        tm //= 2
    tm = min(tm, _round_up(n_a, 8))
    n_a_pad = _round_up(n_a, tm)
    pad = n_a_pad - n_a
    if pad:
        anchor_feature = jnp.pad(anchor_feature, ((0, pad), (0, 0)))
        row_info = jnp.pad(row_info, ((0, pad), (0, 0)))

    kernel = functools.partial(
        _supcon_kernel,
        inv_temperature=float(1.0 / temperature),
        loss_scale=float(temperature / base_temperature),
        n_a=n_a, n_c=n_c, tm=tm, use_label_ids=use_label_ids)

    per_row = pl.pallas_call(
        kernel,
        grid=(n_a_pad // tm,),
        out_shape=jax.ShapeDtypeStruct((n_a_pad, 1), jnp.float32),
        in_specs=[
            pl.BlockSpec((tm, dim), lambda i: (i, 0)),                   # anchor tile
            pl.BlockSpec((n_c, dim), lambda i: (0, 0)),                  # contrast (resident)
            pl.BlockSpec((tm, row_info.shape[1]), lambda i: (i, 0)),     # row labels / mask rows
            pl.BlockSpec((1, n_c), lambda i: (0, 0)),                    # column labels (resident)
        ],
        out_specs=pl.BlockSpec((tm, 1), lambda i: (i, 0)),
        compiler_params=pltpu.CompilerParams(
            dimension_semantics=("parallel",),
            vmem_limit_bytes=64 * 1024 * 1024),
    )(anchor_feature, contrast_feature, row_info, col_lab)

    # loss.view(anchor_count, batch_size).mean() == mean over all anchor rows.
    # TODO(synk): the tiny final reduction over n_a_pad partials stays in XLA so
    # the anchor-row grid axis can remain "parallel" (race-free) across TensorCores.
    return jnp.sum(per_row) / n_a


def _supcon_loss_ref(features, labels=None, *,
                     temperature=0.07, contrast_mode="all", base_temperature=0.07):
    """Pure-JAX reference (mirrors the PyTorch code) for correctness check."""
    bsz, n_views, dim = features.shape
    if labels is None:
        mask = jnp.eye(bsz, dtype=jnp.float32)
    else:
        labels = labels.reshape(-1, 1)
        mask = (labels == labels.T).astype(jnp.float32)
    contrast_feature = jnp.concatenate([features[:, v] for v in range(n_views)], axis=0)
    if contrast_mode == "one":
        anchor_feature, anchor_count = features[:, 0], 1
    else:
        anchor_feature, anchor_count = contrast_feature, n_views
    logits = jnp.matmul(anchor_feature, contrast_feature.T,
                        precision=lax.Precision.HIGHEST) / temperature
    logits = logits - jnp.max(logits, axis=1, keepdims=True)
    n_a = anchor_count * bsz
    n_c = n_views * bsz
    mask = jnp.tile(mask, (anchor_count, n_views))
    logits_mask = 1.0 - jnp.eye(n_a, n_c, dtype=jnp.float32)
    mask = mask * logits_mask
    exp_logits = jnp.exp(logits) * logits_mask
    log_prob = logits - jnp.log(exp_logits.sum(1, keepdims=True))
    mean_log_prob_pos = (mask * log_prob).sum(1) / mask.sum(1)
    loss = -(temperature / base_temperature) * mean_log_prob_pos
    return loss.reshape(anchor_count, bsz).mean()


if __name__ == "__main__":
    key = jax.random.PRNGKey(0)
    k_feat, k_lab = jax.random.split(key)

    bsz, n_views, dim = 8, 2, 32
    features = jax.random.normal(k_feat, (bsz, n_views, dim), dtype=jnp.float32)
    # L2-normalize as is conventional for SupCon
    features = features / jnp.linalg.norm(features, axis=-1, keepdims=True)
    labels = jax.random.randint(k_lab, (bsz,), 0, 4)

    # Supervised (labels), unsupervised SimCLR (no labels), 'one' mode, explicit mask.
    loss_sup = supcon_loss(features, labels=labels)
    loss_unsup = supcon_loss(features)
    loss_one = supcon_loss(features, labels=labels, contrast_mode="one")
    label_mask = (labels[:, None] == labels[None, :]).astype(jnp.float32)
    loss_mask = supcon_loss(features, mask=label_mask)

    # bf16 feature path (halved HBM traffic, bf16 MXU).
    feat_bf16 = features.astype(jnp.bfloat16)
    loss_bf16 = supcon_loss(feat_bf16, labels=labels)

    jax.block_until_ready((loss_sup, loss_unsup, loss_one, loss_mask, loss_bf16))

    ref_sup = _supcon_loss_ref(features, labels=labels)
    ref_unsup = _supcon_loss_ref(features)
    ref_one = _supcon_loss_ref(features, labels=labels, contrast_mode="one")
    ref_bf16 = _supcon_loss_ref(feat_bf16.astype(jnp.float32), labels=labels)

    assert jnp.allclose(loss_sup, ref_sup, rtol=1e-4, atol=1e-4), (loss_sup, ref_sup)
    assert jnp.allclose(loss_unsup, ref_unsup, rtol=1e-4, atol=1e-4), (loss_unsup, ref_unsup)
    assert jnp.allclose(loss_one, ref_one, rtol=1e-4, atol=1e-4), (loss_one, ref_one)
    assert jnp.allclose(loss_mask, ref_sup, rtol=1e-4, atol=1e-4), (loss_mask, ref_sup)
    assert jnp.allclose(loss_bf16, ref_bf16, rtol=1e-2, atol=1e-2), (loss_bf16, ref_bf16)

    print("KERNEL_OK")
</pallas_src>

<mosaic_0001>
module attributes {stable_mosaic.version = 11 : i64} {
  func.func @_supcon_kernel(%arg0: i32, %arg1: memref<16x32xf32, #tpu.memory_space<vmem>>, %arg2: memref<16x32xf32, #tpu.memory_space<vmem>>, %arg3: memref<16x1xi32, #tpu.memory_space<vmem>>, %arg4: memref<1x16xi32, #tpu.memory_space<vmem>>, %arg5: memref<16x1xf32, #tpu.memory_space<vmem>>) attributes {dimension_semantics = [#tpu.dimension_semantics<parallel>], iteration_bounds = array<i64: 1>, scalar_prefetch = 0 : i64, scratch_operands = 0 : i64, tpu.core_type = #tpu.core_type<tc>, window_params = [{transform_indices = @transform_0, window_bounds = array<i64: 16, 32>}, {pipeline_mode = #tpu.pipeline_mode<synchronous>, transform_indices = @transform_1, window_bounds = array<i64: 16, 32>}, {transform_indices = @transform_2, window_bounds = array<i64: 16, 1>}, {pipeline_mode = #tpu.pipeline_mode<synchronous>, transform_indices = @transform_3, window_bounds = array<i64: 1, 16>}, {transform_indices = @transform_4, window_bounds = array<i64: 16, 1>}]} {
    %c0 = arith.constant 0 : index
    %c0_0 = arith.constant 0 : index
    %0 = vector.load %arg1[%c0, %c0_0] : memref<16x32xf32, #tpu.memory_space<vmem>>, vector<16x32xf32>
    %c0_1 = arith.constant 0 : index
    %c0_2 = arith.constant 0 : index
    %1 = vector.load %arg2[%c0_1, %c0_2] : memref<16x32xf32, #tpu.memory_space<vmem>>, vector<16x32xf32>
    %cst = arith.constant dense<0.000000e+00> : vector<16x16xf32>
    %2 = tpu.matmul %0, %1, %cst {dimension_numbers = #tpu.dot_dimension_numbers<[1], [1], [0], [0], [0, 0, 1, 0], [], []>} : vector<16x32xf32>, vector<16x32xf32>, vector<16x16xf32> -> vector<16x16xf32>
    %cst_3 = arith.constant 14.2857141 : f32
    %3 = vector.broadcast %cst_3 : f32 to vector<16x16xf32>
    %4 = arith.mulf %2, %3 : vector<16x16xf32>
    %cst_4 = arith.constant dense<0xFF800000> : vector<16xf32>
    %5 = vector.multi_reduction <maximumf>, %4, %cst_4 [1] : vector<16x16xf32> to vector<16xf32>
    %6 = vector.shape_cast %5 : vector<16xf32> to vector<16x1xf32>
    %7 = vector.broadcast %6 : vector<16x1xf32> to vector<16x16xf32>
    %8 = arith.subf %4, %7 : vector<16x16xf32>
    %c16_i32 = arith.constant 16 : i32
    %9 = arith.muli %arg0, %c16_i32 : i32
    %10 = tpu.iota {dimensions = array<i32: 1>} : vector<16x16xi32>
    %11 = tpu.iota {dimensions = array<i32: 0>} : vector<16x16xi32>
    %12 = vector.broadcast %9 : i32 to vector<16x16xi32>
    %13 = arith.addi %11, %12 : vector<16x16xi32>
    %14 = arith.cmpi ne, %10, %13 : vector<16x16xi32>
    %c0_5 = arith.constant 0 : index
    %c0_6 = arith.constant 0 : index
    %15 = vector.load %arg3[%c0_5, %c0_6] : memref<16x1xi32, #tpu.memory_space<vmem>>, vector<16x1xi32>
    %c0_7 = arith.constant 0 : index
    %c0_8 = arith.constant 0 : index
    %16 = vector.load %arg4[%c0_7, %c0_8] : memref<1x16xi32, #tpu.memory_space<vmem>>, vector<1x16xi32>
    %17 = vector.broadcast %15 : vector<16x1xi32> to vector<16x16xi32>
    %18 = vector.broadcast %16 : vector<1x16xi32> to vector<16x16xi32>
    %19 = arith.cmpi eq, %17, %18 : vector<16x16xi32>
    %20 = arith.andi %19, %14 : vector<16x16xi1>
    %21 = arith.extui %20 : vector<16x16xi1> to vector<16x16xi32>
    %22 = arith.sitofp %21 : vector<16x16xi32> to vector<16x16xf32>
    %23 = math.exp %8 : vector<16x16xf32>
    %cst_9 = arith.constant 0.000000e+00 : f32
    %24 = vector.broadcast %cst_9 : f32 to vector<16x16xf32>
    %25 = arith.select %14, %23, %24 : vector<16x16xi1>, vector<16x16xf32>
    %cst_10 = arith.constant dense<0.000000e+00> : vector<16xf32>
    %26 = vector.multi_reduction <add>, %25, %cst_10 [1] : vector<16x16xf32> to vector<16xf32>
    %27 = vector.shape_cast %26 : vector<16xf32> to vector<16x1xf32>
    %28 = math.log %27 : vector<16x1xf32>
    %cst_11 = arith.constant dense<0.000000e+00> : vector<16xf32>
    %29 = vector.multi_reduction <add>, %22, %cst_11 [1] : vector<16x16xf32> to vector<16xf32>
    %30 = vector.shape_cast %29 : vector<16xf32> to vector<16x1xf32>
    %31 = arith.mulf %22, %8 : vector<16x16xf32>
    %cst_12 = arith.constant dense<0.000000e+00> : vector<16xf32>
    %32 = vector.multi_reduction <add>, %31, %cst_12 [1] : vector<16x16xf32> to vector<16xf32>
    %33 = vector.shape_cast %32 : vector<16xf32> to vector<16x1xf32>
    %34 = arith.mulf %30, %28 : vector<16x1xf32>
    %35 = arith.subf %33, %34 : vector<16x1xf32>
    %36 = tpu.iota {dimensions = array<i32: 0>} : vector<16x1xi32>
    %37 = vector.broadcast %9 : i32 to vector<16x1xi32>
    %38 = arith.addi %36, %37 : vector<16x1xi32>
    %c16_i32_13 = arith.constant 16 : i32
    %39 = vector.broadcast %c16_i32_13 : i32 to vector<16x1xi32>
    %40 = arith.cmpi slt, %38, %39 : vector<16x1xi32>
    %cst_14 = arith.constant 1.000000e+00 : f32
    %41 = vector.broadcast %cst_14 : f32 to vector<16x1xf32>
    %42 = arith.select %40, %30, %41 : vector<16x1xi1>, vector<16x1xf32>
    %cst_15 = arith.constant -1.000000e+00 : f32
    %43 = vector.broadcast %cst_15 : f32 to vector<16x1xf32>
    %44 = arith.mulf %43, %35 : vector<16x1xf32>
    %45 = arith.divf %44, %42 : vector<16x1xf32>
    %cst_16 = arith.constant 0.000000e+00 : f32
    %46 = vector.broadcast %cst_16 : f32 to vector<16x1xf32>
    %47 = arith.select %40, %45, %46 : vector<16x1xi1>, vector<16x1xf32>
    %c0_17 = arith.constant 0 : index
    %c0_18 = arith.constant 0 : index
    %48 = vector.load %arg5[%c0_17, %c0_18] : memref<16x1xf32, #tpu.memory_space<vmem>>, vector<16x1xf32>
    tpu.vector_store %arg5[%c0_17, %c0_18], %47 {strides = array<i32>} : memref<16x1xf32, #tpu.memory_space<vmem>>, vector<16x1xf32>,
    return
  }
  func.func @transform_0(%arg0: i32) -> (i32, i32) {
    %c0_i32 = arith.constant 0 : i32
    %c0_i32_0 = arith.constant 0 : i32
    return %arg0, %c0_i32 : i32, i32
  }
  func.func @transform_1(%arg0: i32) -> (i32, i32) {
    %c0_i32 = arith.constant 0 : i32
    %c0_i32_0 = arith.constant 0 : i32
    %c0_i32_1 = arith.constant 0 : i32
    return %c0_i32, %c0_i32_0 : i32, i32
  }
  func.func @transform_2(%arg0: i32) -> (i32, i32) {
    %c0_i32 = arith.constant 0 : i32
    %c0_i32_0 = arith.constant 0 : i32
    return %arg0, %c0_i32 : i32, i32
  }
  func.func @transform_3(%arg0: i32) -> (i32, i32) {
    %c0_i32 = arith.constant 0 : i32
    %c0_i32_0 = arith.constant 0 : i32
    %c0_i32_1 = arith.constant 0 : i32
    return %c0_i32, %c0_i32_0 : i32, i32
  }
  func.func @transform_4(%arg0: i32) -> (i32, i32) {
    %c0_i32 = arith.constant 0 : i32
    %c0_i32_0 = arith.constant 0 : i32
    return %arg0, %c0_i32 : i32, i32
  }
}

</mosaic_0001>

<bundles_post_ra>
// kernel: tpu_custom_call.1
= control target key start
LH: loop header
LB: loop body
LE: loop exit
PB: predicated region body
PF: predicated region fallthrough
CT: control target
= control target key end

     0   :  { %9 = vsyncpa [#allocation3], 0  ;;  %s560_s0 = inlined_call_operand.hbm [shape: f32[16,32], index: 0, kind: input, shape index: {}]   ;;  %s561_s1 = inlined_call_operand.hbm [shape: f32[16,32], index: 1, kind: input, shape index: {}]   ;;  %s562_s2 = inlined_call_operand.hbm [shape: s32[16,1], index: 2, kind: input, shape index: {}]   ;;  %s563_s3 = inlined_call_operand.hbm [shape: s32[1,16], index: 3, kind: input, shape index: {}]   ;;  %s564_s4 = inlined_call_operand.hbm [shape: f32[16,1], index: 4, kind: output, shape index: {}]  }
   0x1   :  { %10 = vsyncpa [#allocation6], 0 }
   0x2   :  { %11 = vsyncpa [#allocation9], 0 }
   0x3   :  { %12 = vsyncpa [#allocation4], 0  ;;  %s439_s15 = smov [#allocation5]   ;;  %s440_s17 = smov [#allocation2]  }
   0x4   :  { %s30_s16 = sshll.u32 %s439_s15, 4  ;;  %s18_s18 = sshll.u32 %s440_s17, 4  ;;  %s31_s16 = int_to_ptr.vmem [resolvable:$true] %s30_s16  ;;  %s473_s18 = int_to_ptr.vmem [resolvable:$true] %s18_s18 }
   0x5   :  { %s321_s21 = scalar_lea.hbm %s561_s1, 256 }
   0x6   :  { %p322_p0 = scmp.ne.s32.totalorder %s561_s1, %s321_s21  ;;  %p325_p1 = scmp.lt.u32.totalorder %s321_s21, %s561_s1 }
   0x8   :  { %p327_p2 = pnand %p325_p1, %p322_p0 }
   0xa   :  { %330 = shalt.err (!%p327_p2)
}
   0xb   :  { %s331_s26 = scalar_lea.vmem %s31_s16, 256  ;;  %p336_p4 = scmp.lt.s32.totalorder %s31_s16, %s31_s16 }
   0xc   :  { %p332_p3 = scmp.ne.s32.totalorder %s31_s16, %s331_s26  ;;  %p337_p5 = scmp.lt.s32.totalorder %s331_s26, %s331_s26 }
   0xe   :  { %p338_p6 = por %p337_p5, %p336_p4 }
  0x10   :  { %p339_p7 = pnand %p338_p6, %p332_p3 }
  0x12   :  { %342 = shalt.err (!%p339_p7)
}
  0x13   :  { %s441_s27 = smov 128   ;;  %s442_s28 = smov 8  }
  0x14   :  { %36 = dma.hbm_to_vmem [thread:$0]  %s561_s1, 256, %s31_s16, [#allocation6], %s441_s27, %s441_s27, %s442_s28  }
  0x15   :  { %s343_s7 = scalar_lea.hbm %s560_s0, 256 }
  0x16   :  { %p344_p8 = scmp.ne.s32.totalorder %s560_s0, %s343_s7  ;;  %p347_p9 = scmp.lt.u32.totalorder %s343_s7, %s560_s0 }
  0x18   :  { %p349_p10 = pnand %p347_p9, %p344_p8 }
  0x1a   :  { %352 = shalt.err (!%p349_p10)
}
  0x1b   :  { %s353_s12 = scalar_lea.vmem %s473_s18, 256  ;;  %p358_p12 = scmp.lt.s32.totalorder %s473_s18, %s473_s18 }
  0x1c   :  { %p354_p11 = scmp.ne.s32.totalorder %s473_s18, %s353_s12  ;;  %p359_p13 = scmp.lt.s32.totalorder %s353_s12, %s353_s12 }
  0x1e   :  { %p360_p0 = por %p359_p13, %p358_p12 }
  0x20   :  { %p361_p1 = pnand %p360_p0, %p354_p11 }
  0x22   :  { %364 = shalt.err (!%p361_p1)
}
  0x23   :  { %24 = dma.hbm_to_vmem [thread:$0]  %s560_s0, 256, %s473_s18, [#allocation3], %s441_s27, %s441_s27, %s442_s28  }
  0x24   :  { %s443_s14 = smov [#allocation7]   ;;  %s444_s16 = smov [#allocation8]  }
  0x25   :  { %s42_s15 = sshll.u32 %s443_s14, 4  ;;  %s55_s17 = sshll.u32 %s444_s16, 4  ;;  %s43_s15 = int_to_ptr.vmem [resolvable:$true] %s42_s15  ;;  %s56_s17 = int_to_ptr.vmem [resolvable:$true] %s55_s17 }
  0x26   :  { %s365_s21 = scalar_lea.hbm %s562_s2, 256 }
  0x27   :  { %p366_p2 = scmp.ne.s32.totalorder %s562_s2, %s365_s21  ;;  %p369_p3 = scmp.lt.u32.totalorder %s365_s21, %s562_s2 }
  0x29   :  { %p371_p4 = pnand %p369_p3, %p366_p2 }
  0x2b   :  { %374 = shalt.err (!%p371_p4)
}
  0x2c   :  { %s375_s0 = scalar_lea.vmem %s43_s15, 256  ;;  %p380_p6 = scmp.lt.s32.totalorder %s43_s15, %s43_s15 }
  0x2d   :  { %p376_p5 = scmp.ne.s32.totalorder %s43_s15, %s375_s0  ;;  %p381_p7 = scmp.lt.s32.totalorder %s375_s0, %s375_s0 }
  0x2f   :  { %p382_p8 = por %p381_p7, %p380_p6 }
  0x31   :  { %p383_p9 = pnand %p382_p8, %p376_p5 }
  0x33   :  { %386 = shalt.err (!%p383_p9)
}
  0x34   :  { %48 = dma.hbm_to_vmem [thread:$0]  %s562_s2, 256, %s43_s15, [#allocation6], %s441_s27, %s441_s27, %s442_s28  }
  0x35   :  { %s387_s5 = scalar_lea.hbm %s563_s3, 16 }
  0x36   :  { %p388_p10 = scmp.ne.s32.totalorder %s563_s3, %s387_s5  ;;  %p391_p11 = scmp.lt.u32.totalorder %s387_s5, %s563_s3 }
  0x38   :  { %p393_p12 = pnand %p391_p11, %p388_p10 }
  0x3a   :  { %396 = shalt.err (!%p393_p12)
}
  0x3b   :  { %s397_s10 = scalar_lea.vmem %s56_s17, 16  ;;  %s401_s11 = scalar_lea.vmem %s56_s17, 32 }
  0x3c   :  { %p398_p13 = scmp.ne.s32.totalorder %s56_s17, %s397_s10  ;;  %p402_p0 = scmp.lt.s32.totalorder %s56_s17, %s56_s17 }
  0x3d   :  { %p403_p1 = scmp.lt.s32.totalorder %s401_s11, %s397_s10 }
  0x3f   :  { %p404_p2 = por %p403_p1, %p402_p0 }
  0x41   :  { %p405_p3 = pnand %p404_p2, %p398_p13 }
  0x43   :  { %408 = shalt.err (!%p405_p3)
}
  0x44   :  { %58 = dma.hbm_to_vmem [thread:$0]  %s563_s3, 16, %s56_s17, [#allocation9]  }
  0x45   :  { %431 = dma.done.wait [#allocation3], 256  }
  0x46   :  { %432 = vsyncadd [#allocation3], 4294967040 }
  0x47   :  { %433 = dma.done.wait [#allocation6], 512  }
  0x48   :  { %434 = vsyncadd [#allocation6], 4294966784 }
  0x49   :  { %435 = dma.done.wait [#allocation9], 16  }
  0x4a   :  { %436 = vsyncadd [#allocation9], 4294967280  ;;  %vm75_vm0 = vcmask 261120   ;;  %v73_v0 = vld [vmem:[#allocation5] sm:$0xff]  ;;  %v74_v1 = vld [vmem:[#allocation5 + $0x8] sm:$0xff]  ;;  %v445_v6 = vmov 0   ;;  %v175_v17 = vlaneseq }
  0x4b   :  { %vm293_vm1 = vmpackc.low %vm75_vm0, %vm75_vm0  ;;  %v71_v2 = vld [vmem:[#allocation2] sm:$0xff]  ;;  %v292_v3 = vpack.c.bf16 %v74_v1, %v73_v0  ;;  %v72_v4 = vld [vmem:[#allocation2 + $0x8] sm:$0xff]  ;;  %307 = vset.pattern.permute.xlu1 %v445_v6  ;;  %308 = vset.pattern.permute.xlu0 %v445_v6  ;;  %vm165_vm2 = vcmask 130048   ;;  %v446_v30 = vmov 0.0   ;;  %vm252_vm9 = vcmask 7168   ;;  %s447_s3 = smov [#allocation10]  }
  0x4c   :  { %289 = vmatprep.mubr.msk.f32.mxu0 %vm75_vm0, %v71_v2  ;;  %v185_v5 = vld [vmem:[#allocation7] sm:$0xff]  ;;  %v186_v7 = vld [vmem:[#allocation7 + $0x8] sm:$0xff]  ;;  %v176_v22 = vand.u32 127, %v175_v17  ;;  %v178_v23 = vshrl.u32 %v175_v17, 7  ;;  %v278_v24 = vld [vmem:[#allocation8] ss:$0 sm:$0xff] }
  0x4d   :  { %294 = vmatprep.subr.msk.bf16.mxu0 %vm293_vm1, %v292_v3  ;;  %189 = vperm.xlu1 %307, %v185_v5   ;;  %s260_s1 = sshll.u32 %s447_s3, 4  ;;  %s261_s1 = int_to_ptr.vmem [resolvable:$true] %s260_s1 }
  0x4e   :  { %297 = vmatpush3.bf16.xpose.msk.msra.mxu0 %vm293_vm1, %v292_v3  ;;  %vm183_vm3 = vcmp.ne.s32.totalorder %v176_v22, %v178_v23  ;;  %v179_v25 = vadd.s32 8, %v178_v23  ;;  %s409_s13 = scalar_lea.vmem %s261_s1, 256  ;;  %p414_p5 = scmp.lt.s32.totalorder %s261_s1, %s261_s1 }
  0x4f   :  { %p410_p4 = scmp.ne.s32.totalorder %s261_s1, %s409_s13  ;;  %p415_p6 = scmp.lt.s32.totalorder %s409_s13, %s409_s13 }
  0x50   :  { %vm184_vm6 = vcmp.ne.s32.totalorder %v176_v22, %v179_v25 }
  0x51   :  { %192 = vperm.xlu1 %307, %v186_v7   ;;  %p416_p7 = por %p415_p6, %p414_p5 }
  0x53   :  { %p417_p8 = pnand %p416_p7, %p410_p4 }
  0x55   :  { %290 = vmatmul.mubr.msk.f32.vlgmr.msra.gmra.mrb[0].mxu0 %vm75_vm0, %v72_v4 }
  0xcc   :  { %v190_v20 = vpop.permute.xlu1 %189 }
  0xcd   :  { %vm198_vm4 = vcmp.eq.s32.totalorder %v190_v20, %v278_v24 }
  0xce   :  { %vm200_vm5 = vmand %vm198_vm4, %vm183_vm3 }
  0xcf   :  { %v279_v31 = vsel %vm200_vm5, 1.0, %v446_v30 }
  0xd0   :  { %v193_v26 = vpop.permute.xlu1 %192  ;;  %v222_v33 = vsel %vm165_vm2, %v279_v31, 0.0 }
  0xd1   :  { %vm199_vm7 = vcmp.eq.s32.totalorder %v193_v26, %v278_v24 }
  0xd2   :  { %vm201_vm8 = vmand %vm199_vm7, %vm184_vm6 }
  0xd3   :  { %v280_v36 = vsel %vm201_vm8, 1.0, %v446_v30 }
  0xd4   :  { %v225_v37 = vsel %vm165_vm2, %v280_v36, 0.0 }
 0x128   :  { %v291_v8 = vpop.f32.mrb[0].mxu0 }
 0x129   :  { %v154_v9 = vpop.f32.mrb[1].mxu0  ;;  %v164_v11 = vmul.f32 14.285714, %v291_v8 }
 0x12a   :  { %v163_v10 = vmul.f32 14.285714, %v154_v9 }
 0x12b   :  { %v169_v13 = vsel %vm165_vm2, %v164_v11, -inf }
 0x12c   :  { %v166_v12 = vsel %vm165_vm2, %v163_v10, -inf }
 0x12d   :  { %167 = vmax.xlane.f32.xlu0 %v166_v12 }
 0x131   :  { %170 = vmax.xlane.f32.xlu0 %v169_v13 }
 0x1ba   :  { %v168_v14 = vpop.xlane.xlu0 %167 }
 0x1bb   :  { %v172_v15 = vsub.f32 %v163_v10, %v168_v14 }
 0x1bd   :  { %v206_v16 = vmul.f32 1.442695, %v172_v15  ;;  %v228_v38 = vmul.f32 %v279_v31, %v172_v15 }
 0x1be   :  { %v171_v18 = vpop.xlane.xlu0 %170 }
 0x1bf   :  { %309 = vpow2.f32 %v206_v16  ;;  %v173_v19 = vsub.f32 %v164_v11, %v171_v18  ;;  %v230_v39 = vsel %vm165_vm2, %v228_v38, 0.0 }
 0x1c1   :  { %v208_v21 = vmul.f32 1.442695, %v173_v19  ;;  %v229_v40 = vmul.f32 %v280_v36, %v173_v19 }
 0x1c3   :  { %311 = vpow2.f32 %v208_v21  ;;  %v233_v41 = vsel %vm165_vm2, %v229_v40, 0.0 }
 0x1c9   :  { %v310_v27 = vpop.eup %309 }
 0x1ca   :  { %v210_v28 = vsel %vm183_vm3, %v310_v27, 0.0 }
 0x1cb   :  { %v212_v29 = vsel %vm165_vm2, %v210_v28, 0.0 }
 0x1cc   :  { %213 = vadd.xlane.f32.xlu0 %v212_v29 }
 0x1cd   :  { %v312_v32 = vpop.eup %311 }
 0x1ce   :  { %v211_v34 = vsel %vm184_vm6, %v312_v32, 0.0 }
 0x1cf   :  { %v215_v35 = vsel %vm165_vm2, %v211_v34, 0.0 }
 0x1d0   :  { %223 = vadd.xlane.f32.xlu0 %v222_v33  ;;  %216 = vadd.xlane.f32.xlu1 %v215_v35 }
 0x1d4   :  { %226 = vadd.xlane.f32.xlu0 %v225_v37 }
 0x1d8   :  { %231 = vadd.xlane.f32.xlu0 %v230_v39 }
 0x1dc   :  { %234 = vadd.xlane.f32.xlu0 %v233_v41 }
 0x259   :  { %v214_v42 = vpop.xlane.xlu0 %213 }
 0x25a   :  { %313 = vlog2.f32 %v214_v42 }
 0x25d   :  { %v217_v43 = vpop.xlane.xlu1 %216  ;;  %v224_v44 = vpop.xlane.xlu0 %223 }
 0x25e   :  { %315 = vlog2.f32 %v217_v43 }
 0x25f   :  { %317 = vrcp.f32 %v224_v44 }
 0x261   :  { %v227_v45 = vpop.xlane.xlu0 %226 }
 0x262   :  { %319 = vrcp.f32 %v227_v45 }
 0x264   :  { %v314_v46 = vpop.eup %313 }
 0x265   :  { %v219_v47 = vmul.f32 0.6931472, %v314_v46  ;;  %v232_v48 = vpop.xlane.xlu0 %231 }
 0x267   :  { %v236_v49 = vmul.f32 %v224_v44, %v219_v47 }
 0x268   :  { %v316_v50 = vpop.eup %315 }
 0x269   :  { %v221_v51 = vmul.f32 0.6931472, %v316_v50  ;;  %v238_v52 = vsub.f32 %v232_v48, %v236_v49  ;;  %v318_v53 = vpop.eup %317  ;;  %v235_v56 = vpop.xlane.xlu0 %234 }
 0x26b   :  { %v237_v54 = vmul.f32 %v227_v45, %v221_v51  ;;  %v244_v55 = vmul.f32 -1.0, %v238_v52 }
 0x26c   :  { %v320_v60 = vpop.eup %319 }
 0x26d   :  { %v247_v57 = vmul.f32 %v318_v53, %v244_v55  ;;  %v239_v58 = vsub.f32 %v235_v56, %v237_v54 }
 0x26f   :  { %v245_v59 = vmul.f32 -1.0, %v239_v58  ;;  %253 = vst.msk [vmem:[#allocation10] sm:$0xff] %vm252_vm9, %v247_v57 }
 0x271   :  { %v249_v61 = vmul.f32 %v320_v60, %v245_v59 }
 0x273   :  { %254 = vst.msk [vmem:[#allocation10 + $0x8] sm:$0xff] %vm252_vm9, %v249_v61 }
 0x274   :  { %420 = shalt.err (!%p417_p8)
}
 0x275   :  { %s421_s16 = scalar_lea.hbm %s564_s4, 256 }
 0x276   :  { %p422_p9 = scmp.ne.s32.totalorder %s564_s4, %s421_s16  ;;  %p425_p10 = scmp.lt.u32.totalorder %s421_s16, %s564_s4 }
 0x278   :  { %p427_p11 = pnand %p425_p10, %p422_p9 }
 0x27a   :  { %430 = shalt.err (!%p427_p11)
}
 0x27b   :  { %266 = dma.vmem_to_hbm [thread:$0]  %s261_s1, 256, %s564_s4, [#allocation4], %s441_s27, %s441_s27, %s442_s28  }
 0x27c   :  { %437 = dma.done.wait [#allocation4], 256  }
 0x27d   :  { %438 = vsyncadd [#allocation4], 4294967040 }
 0x27e   :  { %270 = vsyncpa [#allocation3], 1 }
 0x27f   :  { %271 = vsyncpa [#allocation6], 1 }
 0x280   :  { %272 = vsyncpa [#allocation9], 1 }
 0x281   :  { %273 = vsyncpa [#allocation4], 1 }

</bundles_post_ra>
